<compile_context>
chip_gen: v6e
topology: v6e:2x2x1
jax: 0.10.0
libtpu: 0.0.40
codegen_flags: <defaults>
</compile_context>

<pallas_src>
import functools

import jax
import jax.numpy as jnp
from jax.experimental import pallas as pl
from jax.experimental.pallas import tpu as pltpu


def _round_up(x: int, m: int) -> int:
    return (x + m - 1) // m * m


def _sublane(dtype) -> int:
    # Minimum second-minor tile for a dtype (f32: 8, bf16: 16, int8/fp8: 32).
    return max(8, 32 // jnp.dtype(dtype).itemsize)


def _actor_kernel(x_ref, slab_ref, bias_ref, out_ref, *, nx, n_out, w2_off, w3_off):
    """One batch tile: (tm, nx) x packed params -> softplus(.) + 1e-6, (tm, n_out)."""
    mm = slab_ref.dtype
    L = slab_ref.shape[1]

    x = x_ref[...].astype(mm)                       # (tm, nx) narrow, un-padded

    # Packed parameter slab (lane width L, all row offsets sublane-aligned):
    #   [0,        nx)        : W1 (nx, h) zero-padded to (nx, L)
    #   [w2_off,   w2_off+L)  : W2 zero-padded to (L, L)
    #   [w3_off,   w3_off+L)  : W3 zero-padded to (L, L)
    w1 = slab_ref[pl.ds(0, nx), :]                  # (nx, L)
    w2 = slab_ref[pl.ds(w2_off, L), :]              # (L, L)
    w3 = slab_ref[pl.ds(w3_off, L), :]              # (L, L)

    # Biases are a separate f32 array (never quantized to bf16).
    b1 = bias_ref[pl.ds(0, 1), :]                   # (1, L) f32
    b2 = bias_ref[pl.ds(1, 1), :]
    b3 = bias_ref[pl.ds(2, 1), :]

    # Layers 1 & 2: Linear + ReLU. MXU matmuls accumulate f32; bias/ReLU f32.
    # Zero-padded weight columns + zero bias padding keep padded lanes exactly 0.
    h1 = jnp.maximum(jnp.dot(x, w1, preferred_element_type=jnp.float32) + b1, 0.0)
    h2 = jnp.maximum(
        jnp.dot(h1.astype(mm), w2, preferred_element_type=jnp.float32) + b2, 0.0
    )

    # Layer 3: Linear + numerically stable softplus + 1e-6.
    z = jnp.dot(h2.astype(mm), w3, preferred_element_type=jnp.float32) + b3
    sp = jnp.maximum(z, 0.0) + jnp.log1p(jnp.exp(-jnp.abs(z))) + 1e-6

    out_ref[...] = sp[:, :n_out]                    # narrow (tm, n_out) store


def pack_params(params, matmul_dtype=jnp.bfloat16):
    """Pack (w1,b1,w2,b2,w3,b3) into one weight slab + f32 bias rows (done once)."""
    w1, b1, w2, b2, w3, b3 = params
    nx, h_dim = w1.shape
    n_out = w3.shape[1]
    L = _round_up(max(h_dim, n_out), 128)
    sub = _sublane(matmul_dtype)

    nx_pad = _round_up(nx, sub)
    w2_off = nx_pad
    w3_off = nx_pad + L
    rows = nx_pad + 2 * L

    slab = jnp.zeros((rows, L), matmul_dtype)
    slab = slab.at[:nx, :h_dim].set(w1.astype(matmul_dtype))
    slab = slab.at[w2_off:w2_off + h_dim, :h_dim].set(w2.astype(matmul_dtype))
    slab = slab.at[w3_off:w3_off + h_dim, :n_out].set(w3.astype(matmul_dtype))

    biases = jnp.zeros((8, L), jnp.float32)
    biases = biases.at[0, :h_dim].set(b1.reshape(-1).astype(jnp.float32))
    biases = biases.at[1, :h_dim].set(b2.reshape(-1).astype(jnp.float32))
    biases = biases.at[2, :n_out].set(b3.reshape(-1).astype(jnp.float32))

    return {"slab": slab, "biases": biases, "nx": nx, "h_dim": h_dim,
            "n_out": n_out, "L": L, "w2_off": w2_off, "w3_off": w3_off}


def actor_net_forward(state, packed, *, block_b=1024):
    """Fused ActorNet forward. Returns (q_diag, r_diag) with PyTorch semantics."""
    slab, biases = packed["slab"], packed["biases"]
    nx, n_out, L = packed["nx"], packed["n_out"], packed["L"]
    nu = n_out - nx

    lead = state.shape[:-1]
    assert state.shape[-1] == nx
    x = state.reshape(-1, nx).astype(jnp.float32)
    B = x.shape[0]

    sub = _sublane(x.dtype)
    # Pick the tile count first so the last tile isn't mostly padding, and
    # guarantee >=2 grid steps when the batch allows it (v7x: 2 TensorCores).
    n_tiles = max(pl.cdiv(B, block_b), min(2, pl.cdiv(B, sub)))
    tm = _round_up(pl.cdiv(B, n_tiles), sub)
    grid_b = pl.cdiv(B, tm)
    B_pad = grid_b * tm
    if B_pad != B:
        x = jnp.pad(x, ((0, B_pad - B), (0, 0)))    # only cheap batch-row pad

    # Realistic VMEM budget from actual tile sizes (double-buffered) + headroom.
    wb = jnp.dtype(slab.dtype).itemsize
    vmem_bytes = (
        2 * slab.size * wb        # weight slab buffers
        + 2 * biases.size * 4     # f32 bias rows
        + 2 * tm * nx * 4         # x tiles
        + 2 * tm * n_out * 4      # out tiles
        + 8 * tm * L * 4          # f32 intermediates / spill headroom
    )
    vmem_limit = int(max(vmem_bytes + (2 << 20), 16 << 20))

    kernel = functools.partial(
        _actor_kernel, nx=nx, n_out=n_out,
        w2_off=packed["w2_off"], w3_off=packed["w3_off"])

    out = pl.pallas_call(
        kernel,
        out_shape=jax.ShapeDtypeStruct((B_pad, n_out), jnp.float32),
        grid=(grid_b,),
        in_specs=[
            pl.BlockSpec((tm, nx), lambda i: (i, 0)),      # narrow batch-tiled input
            pl.BlockSpec(slab.shape, lambda i: (0, 0)),    # resident weight slab
            pl.BlockSpec(biases.shape, lambda i: (0, 0)),  # resident f32 biases
        ],
        out_specs=pl.BlockSpec((tm, n_out), lambda i: (i, 0)),  # narrow output
        compiler_params=pltpu.CompilerParams(
            dimension_semantics=("parallel",),             # v7x: 2 TCs split batch
            vmem_limit_bytes=vmem_limit,
        ),
    )(x, slab, biases)

    out = out[:B]
    q = out[:, :nx].reshape(*lead, nx)
    r = out[:, nx:].reshape(*lead, nu)
    return q, r


def init_params(key, nx, nu, h_dim):
    """Deterministic init mimicking PyTorch default Linear init U[-1/sqrt(fan_in), +]."""
    ks = jax.random.split(key, 6)

    def linear(kw, kb, fan_in, fan_out):
        bound = 1.0 / jnp.sqrt(fan_in)
        w = jax.random.uniform(kw, (fan_in, fan_out), jnp.float32, -bound, bound)
        b = jax.random.uniform(kb, (1, fan_out), jnp.float32, -bound, bound)
        return w, b

    w1, b1 = linear(ks[0], ks[1], nx, h_dim)
    w2, b2 = linear(ks[2], ks[3], h_dim, h_dim)
    w3, b3 = linear(ks[4], ks[5], h_dim, nx + nu)
    return (w1, b1, w2, b2, w3, b3)


def _reference(state, params):
    w1, b1, w2, b2, w3, b3 = params
    h1 = jax.nn.relu(state @ w1 + b1)
    h2 = jax.nn.relu(h1 @ w2 + b2)
    z = h2 @ w3 + b3
    out = jax.nn.softplus(z) + 1e-6
    nx = w1.shape[0]
    return out[..., :nx], out[..., nx:]


if __name__ == "__main__":
    nx, nu, h_dim, batch = 8, 4, 32, 8

    key = jax.random.PRNGKey(0)
    k_params, k_state, k_big = jax.random.split(key, 3)
    params = init_params(k_params, nx, nu, h_dim)
    state = jax.random.normal(k_state, (batch, nx), jnp.float32)
    q_ref, r_ref = _reference(state, params)

    # Default bf16-operand MXU path (native rate on v5e/v6e/v7x); f32 acc/bias/EUP.
    packed = pack_params(params)
    q_diag, r_diag = actor_net_forward(state, packed)
    jax.block_until_ready((q_diag, r_diag))
    assert q_diag.shape == (batch, nx) and r_diag.shape == (batch, nu)
    assert jnp.allclose(q_diag, q_ref, atol=5e-2, rtol=5e-2)
    assert jnp.allclose(r_diag, r_ref, atol=5e-2, rtol=5e-2)

    # f32 matmul-operand path (tight parity with the reference / PyTorch math).
    packed_f32 = pack_params(params, matmul_dtype=jnp.float32)
    q32, r32 = actor_net_forward(state, packed_f32)
    jax.block_until_ready((q32, r32))
    assert jnp.allclose(q32, q_ref, atol=1e-5, rtol=1e-5)
    assert jnp.allclose(r32, r_ref, atol=1e-5, rtol=1e-5)

    # Multi-tile / ragged batch (>=2 grid steps; exercises last-tile padding).
    big = jax.random.normal(k_big, (300, nx), jnp.float32)
    qb, rb = actor_net_forward(big, packed)
    jax.block_until_ready((qb, rb))
    qb_ref, rb_ref = _reference(big, params)
    assert qb.shape == (300, nx) and rb.shape == (300, nu)
    assert jnp.allclose(qb, qb_ref, atol=5e-2, rtol=5e-2)
    assert jnp.allclose(rb, rb_ref, atol=5e-2, rtol=5e-2)

    print("KERNEL_OK")
</pallas_src>

<mosaic_0001>
module attributes {stable_mosaic.version = 11 : i64} {
  func.func @_actor_kernel(%arg0: i32, %arg1: memref<8x8xf32, #tpu.memory_space<vmem>>, %arg2: memref<272x128xbf16, #tpu.memory_space<vmem>>, %arg3: memref<8x128xf32, #tpu.memory_space<vmem>>, %arg4: memref<8x12xf32, #tpu.memory_space<vmem>>) attributes {dimension_semantics = [#tpu.dimension_semantics<parallel>], iteration_bounds = array<i64: 1>, scalar_prefetch = 0 : i64, scratch_operands = 0 : i64, tpu.core_type = #tpu.core_type<tc>, window_params = [{transform_indices = @transform_0, window_bounds = array<i64: 8, 8>}, {pipeline_mode = #tpu.pipeline_mode<synchronous>, transform_indices = @transform_1, window_bounds = array<i64: 272, 128>}, {pipeline_mode = #tpu.pipeline_mode<synchronous>, transform_indices = @transform_2, window_bounds = array<i64: 8, 128>}, {transform_indices = @transform_3, window_bounds = array<i64: 8, 12>}]} {
    %c0 = arith.constant 0 : index
    %c0_0 = arith.constant 0 : index
    %0 = vector.load %arg1[%c0, %c0_0] : memref<8x8xf32, #tpu.memory_space<vmem>>, vector<8x8xf32>
    %1 = arith.truncf %0 : vector<8x8xf32> to vector<8x8xbf16>
    %c0_1 = arith.constant 0 : index
    %c0_2 = arith.constant 0 : index
    %2 = vector.load %arg2[%c0_1, %c0_2] : memref<272x128xbf16, #tpu.memory_space<vmem>>, vector<8x128xbf16>
    %c16 = arith.constant 16 : index
    %c0_3 = arith.constant 0 : index
    %3 = vector.load %arg2[%c16, %c0_3] : memref<272x128xbf16, #tpu.memory_space<vmem>>, vector<128x128xbf16>
    %c144 = arith.constant 144 : index
    %c0_4 = arith.constant 0 : index
    %4 = vector.load %arg2[%c144, %c0_4] : memref<272x128xbf16, #tpu.memory_space<vmem>>, vector<128x128xbf16>
    %c0_5 = arith.constant 0 : index
    %c0_6 = arith.constant 0 : index
    %5 = vector.load %arg3[%c0_5, %c0_6] : memref<8x128xf32, #tpu.memory_space<vmem>>, vector<1x128xf32>
    %c1 = arith.constant 1 : index
    %c0_7 = arith.constant 0 : index
    %6 = vector.load %arg3[%c1, %c0_7] : memref<8x128xf32, #tpu.memory_space<vmem>>, vector<1x128xf32>
    %c2 = arith.constant 2 : index
    %c0_8 = arith.constant 0 : index
    %7 = vector.load %arg3[%c2, %c0_8] : memref<8x128xf32, #tpu.memory_space<vmem>>, vector<1x128xf32>
    %cst = arith.constant dense<0.000000e+00> : vector<8x128xf32>
    %8 = tpu.matmul %1, %2, %cst {dimension_numbers = #tpu.dot_dimension_numbers<[1], [0], [0], [1], [0, 0, 1, 1], [], []>} : vector<8x8xbf16>, vector<8x128xbf16>, vector<8x128xf32> -> vector<8x128xf32>
    %9 = vector.broadcast %5 : vector<1x128xf32> to vector<8x128xf32>
    %10 = arith.addf %8, %9 : vector<8x128xf32>
    %cst_9 = arith.constant 0.000000e+00 : f32
    %11 = vector.broadcast %cst_9 : f32 to vector<8x128xf32>
    %12 = arith.maximumf %10, %11 : vector<8x128xf32>
    %13 = arith.truncf %12 : vector<8x128xf32> to vector<8x128xbf16>
    %cst_10 = arith.constant dense<0.000000e+00> : vector<8x128xf32>
    %14 = tpu.matmul %13, %3, %cst_10 {dimension_numbers = #tpu.dot_dimension_numbers<[1], [0], [0], [1], [0, 0, 1, 1], [], []>} : vector<8x128xbf16>, vector<128x128xbf16>, vector<8x128xf32> -> vector<8x128xf32>
    %15 = vector.broadcast %6 : vector<1x128xf32> to vector<8x128xf32>
    %16 = arith.addf %14, %15 : vector<8x128xf32>
    %cst_11 = arith.constant 0.000000e+00 : f32
    %17 = vector.broadcast %cst_11 : f32 to vector<8x128xf32>
    %18 = arith.maximumf %16, %17 : vector<8x128xf32>
    %19 = arith.truncf %18 : vector<8x128xf32> to vector<8x128xbf16>
    %cst_12 = arith.constant dense<0.000000e+00> : vector<8x128xf32>
    %20 = tpu.matmul %19, %4, %cst_12 {dimension_numbers = #tpu.dot_dimension_numbers<[1], [0], [0], [1], [0, 0, 1, 1], [], []>} : vector<8x128xbf16>, vector<128x128xbf16>, vector<8x128xf32> -> vector<8x128xf32>
    %21 = vector.broadcast %7 : vector<1x128xf32> to vector<8x128xf32>
    %22 = arith.addf %20, %21 : vector<8x128xf32>
    %cst_13 = arith.constant 0.000000e+00 : f32
    %23 = vector.broadcast %cst_13 : f32 to vector<8x128xf32>
    %24 = arith.maximumf %22, %23 : vector<8x128xf32>
    %25 = math.absf %22 : vector<8x128xf32>
    %cst_14 = arith.constant 0.000000e+00 : f32
    %26 = vector.broadcast %cst_14 : f32 to vector<8x128xf32>
    %27 = arith.subf %26, %25 : vector<8x128xf32>
    %28 = math.exp %27 : vector<8x128xf32>
    %29 = math.log1p %28 : vector<8x128xf32>
    %30 = arith.addf %24, %29 : vector<8x128xf32>
    %cst_15 = arith.constant 9.99999997E-7 : f32
    %31 = vector.broadcast %cst_15 : f32 to vector<8x128xf32>
    %32 = arith.addf %30, %31 : vector<8x128xf32>
    %33 = vector.extract_strided_slice %32 {offsets = [0, 0], sizes = [8, 12], strides = [1, 1]} : vector<8x128xf32> to vector<8x12xf32>
    %c0_16 = arith.constant 0 : index
    %c0_17 = arith.constant 0 : index
    %34 = vector.load %arg4[%c0_16, %c0_17] : memref<8x12xf32, #tpu.memory_space<vmem>>, vector<8x12xf32>
    tpu.vector_store %arg4[%c0_16, %c0_17], %33 {strides = array<i32>} : memref<8x12xf32, #tpu.memory_space<vmem>>, vector<8x12xf32>,
    return
  }
  func.func @transform_0(%arg0: i32) -> (i32, i32) {
    %c0_i32 = arith.constant 0 : i32
    %c0_i32_0 = arith.constant 0 : i32
    return %arg0, %c0_i32 : i32, i32
  }
  func.func @transform_1(%arg0: i32) -> (i32, i32) {
    %c0_i32 = arith.constant 0 : i32
    %c0_i32_0 = arith.constant 0 : i32
    %c0_i32_1 = arith.constant 0 : i32
    return %c0_i32, %c0_i32_0 : i32, i32
  }
  func.func @transform_2(%arg0: i32) -> (i32, i32) {
    %c0_i32 = arith.constant 0 : i32
    %c0_i32_0 = arith.constant 0 : i32
    %c0_i32_1 = arith.constant 0 : i32
    return %c0_i32, %c0_i32_0 : i32, i32
  }
  func.func @transform_3(%arg0: i32) -> (i32, i32) {
    %c0_i32 = arith.constant 0 : i32
    %c0_i32_0 = arith.constant 0 : i32
    return %arg0, %c0_i32 : i32, i32
  }
}

</mosaic_0001>

<bundles_post_ra>
// kernel: tpu_custom_call.1
= control target key start
LH: loop header
LB: loop body
LE: loop exit
PB: predicated region body
PF: predicated region fallthrough
CT: control target
= control target key end

     0   :  { %8 = vsyncpa [#allocation3], 0  ;;  %s628_s0 = inlined_call_operand.hbm [shape: f32[8,8], index: 0, kind: input, shape index: {}]   ;;  %s629_s1 = inlined_call_operand.hbm [shape: bf16[272,128], index: 1, kind: input, shape index: {}]   ;;  %s630_s2 = inlined_call_operand.hbm [shape: f32[8,128], index: 2, kind: input, shape index: {}]   ;;  %s631_s3 = inlined_call_operand.hbm [shape: f32[8,12], index: 3, kind: output, shape index: {}]  }
   0x1   :  { %9 = vsyncpa [#allocation6], 0 }
   0x2   :  { %10 = vsyncpa [#allocation4], 0  ;;  %s565_s12 = smov [#allocation5]  }
   0x3   :  { %s26_s13 = sshll.u32 %s565_s12, 4  ;;  %s27_s13 = int_to_ptr.vmem [resolvable:$true] %s26_s13 }
   0x4   :  { %s487_s14 = scalar_lea.vmem %s27_s13, 2176  ;;  %p492_p1 = scmp.lt.s32.totalorder %s27_s13, %s27_s13 }
   0x5   :  { %p488_p0 = scmp.ne.s32.totalorder %s27_s13, %s487_s14  ;;  %p493_p2 = scmp.lt.s32.totalorder %s487_s14, %s487_s14 }
   0x7   :  { %p494_p3 = por %p493_p2, %p492_p1 }
   0x9   :  { %p495_p4 = pnand %p494_p3, %p488_p0 }
   0xb   :  { %498 = shalt.err (!%p495_p4)
}
   0xc   :  { %s566_s15 = smov 64   ;;  %s567_s16 = smov 4  }
   0xd   :  { %32 = dma.hbm_to_vmem [thread:$0]  %s629_s1, 2176, %s27_s13, [#allocation6], %s566_s15, %s566_s15, %s567_s16  }
   0xe   :  { %s568_s19 = smov [#allocation2]   ;;  %s569_s21 = smov [#allocation7]  }
   0xf   :  { %s17_s20 = sshll.u32 %s568_s19, 4  ;;  %s39_s22 = sshll.u32 %s569_s21, 4  ;;  %s18_s20 = int_to_ptr.vmem [resolvable:$true] %s17_s20  ;;  %s40_s22 = int_to_ptr.vmem [resolvable:$true] %s39_s22 }
  0x10   :  { %s507_s23 = scalar_lea.vmem %s18_s20, 128  ;;  %p512_p6 = scmp.lt.s32.totalorder %s18_s20, %s18_s20 }
  0x11   :  { %p508_p5 = scmp.ne.s32.totalorder %s18_s20, %s507_s23  ;;  %p513_p7 = scmp.lt.s32.totalorder %s507_s23, %s507_s23 }
  0x13   :  { %p514_p8 = por %p513_p7, %p512_p6 }
  0x15   :  { %p515_p9 = pnand %p514_p8, %p508_p5 }
  0x17   :  { %518 = shalt.err (!%p515_p9)
}
  0x18   :  { %20 = dma.hbm_to_vmem [thread:$0]  %s628_s0, 128, %s18_s20, [#allocation3]  }
  0x19   :  { %s527_s26 = scalar_lea.vmem %s40_s22, 128  ;;  %p532_p11 = scmp.lt.s32.totalorder %s40_s22, %s40_s22 }
  0x1a   :  { %p528_p10 = scmp.ne.s32.totalorder %s40_s22, %s527_s26  ;;  %p533_p12 = scmp.lt.s32.totalorder %s527_s26, %s527_s26 }
  0x1c   :  { %p534_p13 = por %p533_p12, %p532_p11 }
  0x1e   :  { %p535_p0 = pnand %p534_p13, %p528_p10 }
  0x20   :  { %538 = shalt.err (!%p535_p0)
}
  0x21   :  { %42 = dma.hbm_to_vmem [thread:$0]  %s630_s2, 128, %s40_s22, [#allocation6]  }
  0x22   :  { %559 = dma.done.wait [#allocation3], 128  }
  0x23   :  { %560 = vsyncadd [#allocation3], 4294967168 }
  0x24   :  { %561 = dma.done.wait [#allocation6], 2304  }
  0x25   :  { %562 = vsyncadd [#allocation6], 4294964992  ;;  %v570_v0 = vmov 0.0   ;;  %vm571_vm0 = vmmov 0   ;;  %vm99_vm1 = vcmask 1043456   ;;  %v53_v2 = vld [vmem:[#allocation2] sm:$0xff] }
  0x26   :  { %405 = vmatprep.subr.bf16.mxu0 %v570_v0  ;;  %407 = vmatprep.mubr.msk.bf16.mxu0 %vm571_vm0, %v570_v0  ;;  %v55_v1 = vld [vmem:[#allocation5] sm:$0xf]  ;;  %v54_v4 = vpack.c.bf16 %v53_v2, %v53_v2  ;;  %vm95_vm2 = vcmask 64512   ;;  %v460_v6 = vld [vmem:[#allocation5 + $0x38] sm:$0xff]   ;;  %v461_v7 = vld [vmem:[#allocation5 + $0x30] sm:$0xff]   ;;  %s572_s0 = smov [#allocation8]  }
  0x27   :  { %411 = vmatprep.subr.bf16.mxu1 %v570_v0  ;;  %427 = vmatprep.mubr.msk.bf16.mxu1 %vm571_vm0, %v570_v0  ;;  %v101_v3 = vsel %vm99_vm1, %v55_v1, 0  ;;  %v459_v5 = vld [vmem:[#allocation5 + $0x40] sm:$0xff]   ;;  %v462_v8 = vld [vmem:[#allocation5 + $0x28] sm:$0xff]   ;;  %v464_v10 = vld [vmem:[#allocation5 + $0x18] sm:$0xff]   ;;  %s355_s2 = sshll.u32 %s572_s0, 4  ;;  %vm347_vm4 = vcmask 97280   ;;  %s356_s2 = int_to_ptr.vmem [resolvable:$true] %s355_s2 }
  0x28   :  { %406 = vmatpush3.bf16.msra.mxu0 %v101_v3  ;;  %412 = vmatpush3.bf16.msra.mxu1 %v459_v5  ;;  %v463_v9 = vld [vmem:[#allocation5 + $0x20] sm:$0xff]   ;;  %v465_v11 = vld [vmem:[#allocation5 + $0x10] sm:$0xff]   ;;  %v466_v12 = vld [vmem:[#allocation5 + $0x8] sm:$0xff]   ;;  %s539_s28 = scalar_lea.vmem %s356_s2, 128  ;;  %p544_p2 = scmp.lt.s32.totalorder %s356_s2, %s356_s2 }
  0x29   :  { %431 = vmatprep.subr.bf16.mxu0 %v570_v0  ;;  %413 = vmatprep.subr.bf16.mxu1 %v570_v0  ;;  %v467_v13 = vld [vmem:[#allocation5 + $0x80] sm:$0xff]   ;;  %v468_v14 = vld [vmem:[#allocation5 + $0x78] sm:$0xff]   ;;  %v469_v15 = vld [vmem:[#allocation5 + $0x70] sm:$0xff]   ;;  %p540_p1 = scmp.ne.s32.totalorder %s356_s2, %s539_s28  ;;  %p545_p3 = scmp.lt.s32.totalorder %s539_s28, %s539_s28 }
  0x2a   :  { %v470_v16 = vld [vmem:[#allocation5 + $0x68] sm:$0xff]   ;;  %v471_v17 = vld [vmem:[#allocation5 + $0x60] sm:$0xff]   ;;  %v472_v18 = vld [vmem:[#allocation5 + $0x58] sm:$0xff]  }
  0x2b   :  { %408 = vmatmul.mubr.msk.bf16.vlgmr.msra.gmra.mxu0 %vm95_vm2, %v54_v4  ;;  %v365_v19 = vld [vmem:[#allocation7] ss:$0 sm:$0xff]  ;;  %v473_v27 = vld [vmem:[#allocation5 + $0x50] sm:$0xff]   ;;  %v367_v29 = vld [vmem:[#allocation7 + $0x1] ss:$0 sm:$0xff]  ;;  %p546_p4 = por %p545_p3, %p544_p2 }
  0x2c   :  { %447 = vmatprep.mubr.msk.bf16.mxu0 %vm571_vm0, %v570_v0  ;;  %414 = vmatpush3.bf16.msra.mxu1 %v460_v6  ;;  %v474_v28 = vld [vmem:[#allocation5 + $0x48] sm:$0xff]  }
  0x2d   :  { %415 = vmatprep.subr.bf16.mxu1 %v570_v0  ;;  %432 = vmatpush3.bf16.msra.mxu0 %v467_v13  ;;  %v376_v37 = vld [vmem:[#allocation7 + $0x2] ss:$0 sm:$0xff]  ;;  %p547_p5 = pnand %p546_p4, %p540_p1 }
  0x2e   :  { %433 = vmatprep.subr.bf16.mxu0 %v570_v0 }
  0x30   :  { %416 = vmatpush3.bf16.msra.mxu1 %v461_v7 }
  0x31   :  { %417 = vmatprep.subr.bf16.mxu1 %v570_v0  ;;  %434 = vmatpush3.bf16.msra.mxu0 %v468_v14 }
  0x32   :  { %435 = vmatprep.subr.bf16.mxu0 %v570_v0 }
  0x34   :  { %418 = vmatpush3.bf16.msra.mxu1 %v462_v8 }
  0x35   :  { %419 = vmatprep.subr.bf16.mxu1 %v570_v0  ;;  %436 = vmatpush3.bf16.msra.mxu0 %v469_v15 }
  0x36   :  { %437 = vmatprep.subr.bf16.mxu0 %v570_v0 }
  0x38   :  { %420 = vmatpush3.bf16.msra.mxu1 %v463_v9 }
  0x39   :  { %421 = vmatprep.subr.bf16.mxu1 %v570_v0  ;;  %438 = vmatpush3.bf16.msra.mxu0 %v470_v16 }
  0x3a   :  { %439 = vmatprep.subr.bf16.mxu0 %v570_v0 }
  0x3c   :  { %422 = vmatpush3.bf16.msra.mxu1 %v464_v10 }
  0x3d   :  { %423 = vmatprep.subr.bf16.mxu1 %v570_v0  ;;  %440 = vmatpush3.bf16.msra.mxu0 %v471_v17 }
  0x3e   :  { %441 = vmatprep.subr.bf16.mxu0 %v570_v0 }
  0x40   :  { %424 = vmatpush3.bf16.msra.mxu1 %v465_v11 }
  0x41   :  { %425 = vmatprep.subr.bf16.mxu1 %v570_v0  ;;  %442 = vmatpush3.bf16.msra.mxu0 %v472_v18 }
  0x42   :  { %443 = vmatprep.subr.bf16.mxu0 %v570_v0 }
  0x44   :  { %426 = vmatpush3.bf16.msra.mxu1 %v466_v12 }
  0x45   :  { %444 = vmatpush3.bf16.msra.mxu0 %v473_v27 }
  0x46   :  { %445 = vmatprep.subr.bf16.mxu0 %v570_v0 }
  0x49   :  { %446 = vmatpush3.bf16.msra.mxu0 %v474_v28 }
  0xeb   :  { %v137_v20 = vpop.f32.mrf.mxu0 }
  0xec   :  { %v138_v21 = vadd.f32 %v365_v19, %v137_v20 }
  0xed   :  { %v409_v22 = vpop.f32.mrf.mxu0 }
  0xee   :  { %v143_v23 = vmax.f32 %v138_v21, 0.0 }
  0xef   :  { %v140_v24 = vpop.f32.mrf.mxu0 }
  0xf0   :  { %v144_v25 = vpack.c.bf16 %v143_v23, %v143_v23 }
  0xf1   :  { %v410_v26 = vpop.f32.mrf.mxu0 }
  0xf2   :  { %428 = vmatmul.mubr.bf16.vlgmr.msra.gmra.mxu1 %v144_v25 }
 0x1b2   :  { %v231_v30 = vpop.f32.mrf.mxu1 }
 0x1b3   :  { %v232_v31 = vadd.f32 %v367_v29, %v231_v30 }
 0x1b4   :  { %v429_v32 = vpop.f32.mrf.mxu1 }
 0x1b5   :  { %v237_v33 = vmax.f32 %v232_v31, 0.0 }
 0x1b6   :  { %v234_v34 = vpop.f32.mrf.mxu1 }
 0x1b7   :  { %v238_v35 = vpack.c.bf16 %v237_v33, %v237_v33 }
 0x1b8   :  { %v430_v36 = vpop.f32.mrf.mxu1 }
 0x1b9   :  { %448 = vmatmul.mubr.bf16.vlgmr.msra.gmra.mxu0 %v238_v35 }
 0x279   :  { %v325_v38 = vpop.f32.mrf.mxu0 }
 0x27a   :  { %v326_v39 = vadd.f32 %v376_v37, %v325_v38 }
 0x27b   :  { %v449_v40 = vpop.f32.mrf.mxu0 }
 0x27c   :  { %v332_v41 = vand.u32 2147483647, %v326_v39  ;;  %v331_v54 = vmax.f32 %v326_v39, 0.0 }
 0x27d   :  { %v328_v42 = vpop.f32.mrf.mxu0 }
 0x27e   :  { %v333_v43 = vsub.f32 0.0, %v332_v41 }
 0x27f   :  { %v450_v44 = vpop.f32.mrf.mxu0 }
 0x280   :  { %v334_v45 = vmul.f32 1.442695, %v333_v43 }
 0x282   :  { %475 = vpow2.f32 %v334_v45 }
 0x28f   :  { %v476_v46 = vpop.eup %475 }
 0x290   :  { %v336_v47 = vadd.f32 1.0, %v476_v46  ;;  %v339_v48 = vmul.f32 -0.5, %v476_v46  ;;  %v342_v50 = vand.u32 2147483647, %v476_v46 }
 0x292   :  { %477 = vlog2.f32 %v336_v47  ;;  %v340_v49 = vadd.f32 1.0, %v339_v48  ;;  %vm343_vm3 = vcmp.lt.f32.partialorder %v342_v50, 0.0004427343 }
 0x294   :  { %v341_v53 = vmul.f32 %v476_v46, %v340_v49 }
 0x29f   :  { %v478_v51 = vpop.eup %477 }
 0x2a0   :  { %v338_v52 = vmul.f32 0.6931472, %v478_v51 }
 0x2a2   :  { %v344_v55 = vsel %vm343_vm3, %v341_v53, %v338_v52 }
 0x2a3   :  { %v345_v56 = vadd.f32 %v344_v55, %v331_v54 }
 0x2a5   :  { %v346_v57 = vadd.f32 1e-06, %v345_v56 }
 0x2a7   :  { %348 = vst.msk [vmem:[#allocation8] sm:$0xff] %vm347_vm4, %v346_v57 }
 0x2a8   :  { %550 = shalt.err (!%p547_p5)
}
 0x2a9   :  { %358 = dma.vmem_to_hbm [thread:$0]  %s356_s2, 128, %s631_s3, [#allocation4]  }
 0x2aa   :  { %563 = dma.done.wait [#allocation4], 128  }
 0x2ab   :  { %564 = vsyncadd [#allocation4], 4294967168 }
 0x2ac   :  { %362 = vsyncpa [#allocation3], 1 }
 0x2ad   :  { %363 = vsyncpa [#allocation6], 1 }
 0x2ae   :  { %364 = vsyncpa [#allocation4], 1 }

</bundles_post_ra>
